<compile_context>
chip_gen: v7x
topology: tpu7x:2x2x1
jax: 0.10.0
libtpu: 0.0.40
codegen_flags: <defaults>
</compile_context>

<pallas_src>
import functools
import math

import jax
import jax.numpy as jnp
from jax.experimental import pallas as pl
from jax.experimental.pallas import tpu as pltpu

EPS = 1e-3  # BatchNorm2d eps used by the PyTorch module


# ------------------------------- Pallas kernel -------------------------------

def _downsampler_kernel(q_ref, w_ref, cs_ref, ps_ref, pb_ref, o_ref, *, cin, cconv):
    """One (image, spatial-band) step of conv+maxpool+concat+BN+ReLU.

    q_ref : (1, 9*Cin, HWb) bf16  im2col band, tap-major along sublanes
    w_ref : (Cconv, 9*Cin)  bf16  conv weights with BN scale folded in
    cs_ref: (Cconv, 1)      f32   conv-branch BN shift (conv bias folded in)
    ps_ref: (Cin, 1)        f32   pool-branch BN scale
    pb_ref: (Cin, 1)        f32   pool-branch BN shift
    o_ref : (1, Cout, HWb)  out   NCHW rows (Cout = Cconv + Cin)
    """
    # 3x3 / stride-2 / pad-1 conv for the whole band: single K = 9*Cin dot.
    conv = jnp.dot(w_ref[...], q_ref[0],
                   preferred_element_type=jnp.float32)          # (Cconv, HWb)
    conv = conv + cs_ref[...]

    # MaxPool2d(2, stride=2): its 4 operands are exactly im2col taps
    # (kh,kw) = (1,1),(1,2),(2,1),(2,2)  ->  tap blocks 4, 5, 7, 8.
    def tap(t):
        return q_ref[0, t * cin:(t + 1) * cin, :].astype(jnp.float32)

    pool = jnp.maximum(jnp.maximum(tap(4), tap(5)),
                       jnp.maximum(tap(7), tap(8)))              # (Cin, HWb)
    pool = pool * ps_ref[...] + pb_ref[...]

    # BN shift already applied; ReLU + lane-dense stores straight into NCHW.
    o_ref[0, 0:cconv, :] = jnp.maximum(conv, 0.0).astype(o_ref.dtype)
    o_ref[0, cconv:cconv + cin, :] = jnp.maximum(pool, 0.0).astype(o_ref.dtype)


# ------------------------------- small helpers --------------------------------

def _round_up(v, m):
    return (v + m - 1) // m * m


def _vmem_limit_bytes():
    cap = 64 * 1024 * 1024  # conservative fallback (v7x physical)
    try:
        info = pltpu.get_tpu_info()
        cap = int(getattr(info, "vmem_capacity_bytes", cap) or cap)
    except Exception:
        pass
    return max(32 * 1024 * 1024, min(int(cap * 0.85), 110 * 1024 * 1024))


def _rows_per_band(Ho, Wo, per_pixel_bytes, budget_bytes, want_multi):
    """Pick output rows per band: largest legal band that fits the VMEM budget.

    A band of r rows is layout-legal iff r*Wo % 128 == 0 (lane-dense blocks)
    or r == Ho (block equals the full array extent).
    """
    rows_fit = max(1, budget_bytes // max(1, per_pixel_bytes * Wo))
    legal = [r for r in range(1, Ho + 1)
             if Ho % r == 0 and ((r * Wo) % 128 == 0 or r == Ho)]
    fitting = [r for r in legal if r <= rows_fit]
    if want_multi:  # batch 1: prefer >=2 grid steps so both v7x TCs get work
        fitting = [r for r in fitting if r < Ho] or fitting
    return max(fitting) if fitting else min(legal)


# ------------------------------ Forward wrapper --------------------------------

def downsampler_forward(params, x_nchw, out_dtype=None):
    """DownsamplerBlock forward.  x: [N, Cin, H, W] -> [N, Cout, H/2, W/2]."""
    w, b = params["conv_w"], params["conv_b"]          # [Cconv, Cin, 3, 3], [Cconv]
    gamma, beta, rmean, rvar = params["bn"]
    out_dtype = x_nchw.dtype if out_dtype is None else out_dtype

    N, Cin, H, W = x_nchw.shape
    assert H % 2 == 0 and W % 2 == 0, "DownsamplerBlock needs even H, W"
    Cconv = w.shape[0]
    Cout = Cconv + Cin
    assert gamma.shape[0] == Cout
    Ho, Wo = H // 2, W // 2
    HW = Ho * Wo
    K = 9 * Cin

    # ---- fold eval-mode BatchNorm (in f32, then cast) -------------------------
    inv = gamma / jnp.sqrt(rvar + EPS)                  # per-channel BN scale
    s_c, s_p = inv[:Cconv], inv[Cconv:]
    wk = (jnp.transpose(w, (0, 2, 3, 1)).reshape(Cconv, K)      # (Cconv, 9*Cin)
          * s_c[:, None]).astype(jnp.bfloat16)
    conv_shift = ((b - rmean[:Cconv]) * s_c + beta[:Cconv]
                  ).reshape(Cconv, 1).astype(jnp.float32)
    pool_scale = s_p.reshape(Cin, 1).astype(jnp.float32)
    pool_shift = (beta[Cconv:] - rmean[Cconv:] * s_p
                  ).reshape(Cin, 1).astype(jnp.float32)

    # ---- im2col operand, channels-in-sublanes / spatial-in-lanes --------------
    # q[n, (kh*3+kw)*Cin + c, i*Wo + j] = xpad[n, c, 2i+kh, 2j+kw]
    x = x_nchw.astype(jnp.bfloat16)                     # cast BEFORE the transform
    xpad = jnp.pad(x, ((0, 0), (0, 0), (1, 1), (1, 1)))
    taps = []
    for kh in range(3):
        for kw in range(3):
            v = xpad[:, :, kh:kh + 2 * Ho:2, kw:kw + 2 * Wo:2]  # (N, Cin, Ho, Wo)
            taps.append(v.reshape(N, Cin, HW))
    q = jnp.concatenate(taps, axis=1)                   # (N, 9*Cin, HW) bf16

    # ---- VMEM budget -> spatial band size --------------------------------------
    vmem_limit = _vmem_limit_bytes()
    out_itemsize = jnp.dtype(out_dtype).itemsize
    per_pixel = (2 * _round_up(K, 8) * 2                # double-buffered bf16 im2col
                 + 2 * _round_up(Cout, 8) * out_itemsize   # double-buffered output
                 + (_round_up(Cout, 8) + _round_up(Cin, 8)) * 4)  # live f32 values
    rows = _rows_per_band(Ho, Wo, per_pixel, int(vmem_limit * 0.6),
                          want_multi=(N == 1))
    G = Ho // rows
    HWb = rows * Wo

    # ---- fused Pallas call ------------------------------------------------------
    kernel = functools.partial(_downsampler_kernel, cin=Cin, cconv=Cconv)
    flops = 2 * N * HW * K * Cconv
    bytes_accessed = int(q.size * 2 + wk.size * 2 + (Cconv + 2 * Cin) * 4
                         + N * HW * Cout * out_itemsize)
    out = pl.pallas_call(
        kernel,
        out_shape=jax.ShapeDtypeStruct((N, Cout, HW), out_dtype),
        grid=(N, G),
        in_specs=[
            pl.BlockSpec((1, K, HWb), lambda n, g: (n, 0, g)),
            pl.BlockSpec((Cconv, K), lambda n, g: (0, 0)),   # resident weights
            pl.BlockSpec((Cconv, 1), lambda n, g: (0, 0)),
            pl.BlockSpec((Cin, 1), lambda n, g: (0, 0)),
            pl.BlockSpec((Cin, 1), lambda n, g: (0, 0)),
        ],
        out_specs=pl.BlockSpec((1, Cout, HWb), lambda n, g: (n, 0, g)),
        compiler_params=pltpu.CompilerParams(
            dimension_semantics=("parallel", "parallel"),
            vmem_limit_bytes=vmem_limit),
        cost_estimate=pl.CostEstimate(flops=flops, transcendentals=0,
                                      bytes_accessed=bytes_accessed),
    )(q, wk, conv_shift, pool_scale, pool_shift)

    # Output is already NCHW (channels-in-sublanes layout) -- no transpose.
    return out.reshape(N, Cout, Ho, Wo)


# --------------------------- Params / pure-JAX reference ----------------------

def init_downsampler(key, ninput, noutput):
    kw_, kb_, kbn = jax.random.split(key, 3)
    cconv = noutput - ninput
    bound = 1.0 / math.sqrt(ninput * 9)
    conv_w = jax.random.uniform(kw_, (cconv, ninput, 3, 3), jnp.float32, -bound, bound)
    conv_b = jax.random.uniform(kb_, (cconv,), jnp.float32, -bound, bound)
    k1, k2, k3, k4 = jax.random.split(kbn, 4)
    gamma = jax.random.uniform(k1, (noutput,), jnp.float32, 0.5, 1.5)
    beta = jax.random.uniform(k2, (noutput,), jnp.float32, -0.1, 0.1)
    rmean = 0.1 * jax.random.normal(k3, (noutput,), jnp.float32)
    rvar = jax.random.uniform(k4, (noutput,), jnp.float32, 0.5, 1.5)
    return {"conv_w": conv_w, "conv_b": conv_b, "bn": (gamma, beta, rmean, rvar)}


def downsampler_reference(params, x_nchw):
    """Pure-JAX reference mirroring the PyTorch module (eval-mode BN)."""
    w, b = params["conv_w"], params["conv_b"]
    gamma, beta, rmean, rvar = params["bn"]
    conv = jax.lax.conv_general_dilated(
        x_nchw, w, window_strides=(2, 2), padding=((1, 1), (1, 1)),
        dimension_numbers=("NCHW", "OIHW", "NCHW"))
    conv = conv + b[None, :, None, None]
    pool = jax.lax.reduce_window(x_nchw, -jnp.inf, jax.lax.max,
                                 (1, 1, 2, 2), (1, 1, 2, 2), "VALID")
    y = jnp.concatenate([conv, pool], axis=1)
    inv = (gamma / jnp.sqrt(rvar + EPS))[None, :, None, None]
    y = (y - rmean[None, :, None, None]) * inv + beta[None, :, None, None]
    return jnp.maximum(y, 0.0)


# ------------------------------------ Main ------------------------------------

if __name__ == "__main__":
    key = jax.random.PRNGKey(0)
    pkey, xkey = jax.random.split(key)
    ninput, noutput = 4, 16
    params = init_downsampler(pkey, ninput, noutput)
    x = jax.random.normal(xkey, (2, ninput, 16, 16), jnp.float32)   # NCHW like PyTorch

    fwd = jax.jit(downsampler_forward)
    out = jax.block_until_ready(fwd(params, x))
    assert out.shape == (2, noutput, 8, 8), out.shape
    assert bool(jnp.isfinite(out).all())

    ref = downsampler_reference(params, x)
    max_err = float(jnp.max(jnp.abs(out - ref)))
    assert bool(jnp.allclose(out, ref, atol=5e-2, rtol=5e-2)), f"max abs err {max_err}"

    # bf16-output path (halves output HBM traffic; consumer-facing option).
    fwd_bf16 = jax.jit(functools.partial(downsampler_forward, out_dtype=jnp.bfloat16))
    out_bf16 = jax.block_until_ready(fwd_bf16(params, x)).astype(jnp.float32)
    assert bool(jnp.allclose(out_bf16, ref, atol=8e-2, rtol=8e-2))

    print("KERNEL_OK")
</pallas_src>

<mosaic_0001>
module attributes {stable_mosaic.version = 11 : i64} {
  func.func @_downsampler_kernel(%arg0: i32, %arg1: i32, %arg2: memref<1x36x64xbf16, #tpu.memory_space<vmem>>, %arg3: memref<12x36xbf16, #tpu.memory_space<vmem>>, %arg4: memref<12x1xf32, #tpu.memory_space<vmem>>, %arg5: memref<4x1xf32, #tpu.memory_space<vmem>>, %arg6: memref<4x1xf32, #tpu.memory_space<vmem>>, %arg7: memref<1x16x64xf32, #tpu.memory_space<vmem>>) attributes {dimension_semantics = [#tpu.dimension_semantics<parallel>, #tpu.dimension_semantics<parallel>], iteration_bounds = array<i64: 2, 1>, scalar_prefetch = 0 : i64, scratch_operands = 0 : i64, tpu.core_type = #tpu.core_type<tc>, window_params = [{transform_indices = @transform_0, window_bounds = array<i64: 1, 36, 64>}, {pipeline_mode = #tpu.pipeline_mode<synchronous>, transform_indices = @transform_1, window_bounds = array<i64: 12, 36>}, {pipeline_mode = #tpu.pipeline_mode<synchronous>, transform_indices = @transform_2, window_bounds = array<i64: 12, 1>}, {pipeline_mode = #tpu.pipeline_mode<synchronous>, transform_indices = @transform_3, window_bounds = array<i64: 4, 1>}, {pipeline_mode = #tpu.pipeline_mode<synchronous>, transform_indices = @transform_4, window_bounds = array<i64: 4, 1>}, {transform_indices = @transform_5, window_bounds = array<i64: 1, 16, 64>}]} {
    %c0 = arith.constant 0 : index
    %c0_0 = arith.constant 0 : index
    %0 = vector.load %arg3[%c0, %c0_0] : memref<12x36xbf16, #tpu.memory_space<vmem>>, vector<12x36xbf16>
    %c0_1 = arith.constant 0 : index
    %c0_2 = arith.constant 0 : index
    %c0_3 = arith.constant 0 : index
    %1 = vector.load %arg2[%c0_1, %c0_2, %c0_3] : memref<1x36x64xbf16, #tpu.memory_space<vmem>>, vector<1x36x64xbf16>
    %2 = vector.shape_cast %1 : vector<1x36x64xbf16> to vector<36x64xbf16>
    %cst = arith.constant dense<0.000000e+00> : vector<12x64xf32>
    %3 = tpu.matmul %0, %2, %cst {dimension_numbers = #tpu.dot_dimension_numbers<[1], [0], [0], [1], [0, 0, 1, 1], [], []>} : vector<12x36xbf16>, vector<36x64xbf16>, vector<12x64xf32> -> vector<12x64xf32>
    %c0_4 = arith.constant 0 : index
    %c0_5 = arith.constant 0 : index
    %4 = vector.load %arg4[%c0_4, %c0_5] : memref<12x1xf32, #tpu.memory_space<vmem>>, vector<12x1xf32>
    %5 = vector.broadcast %4 : vector<12x1xf32> to vector<12x64xf32>
    %6 = arith.addf %3, %5 : vector<12x64xf32>
    %c0_6 = arith.constant 0 : index
    %c16 = arith.constant 16 : index
    %c0_7 = arith.constant 0 : index
    %7 = vector.load %arg2[%c0_6, %c16, %c0_7] : memref<1x36x64xbf16, #tpu.memory_space<vmem>>, vector<1x4x64xbf16>
    %8 = vector.shape_cast %7 : vector<1x4x64xbf16> to vector<4x64xbf16>
    %9 = arith.extf %8 : vector<4x64xbf16> to vector<4x64xf32>
    %c0_8 = arith.constant 0 : index
    %c20 = arith.constant 20 : index
    %c0_9 = arith.constant 0 : index
    %10 = vector.load %arg2[%c0_8, %c20, %c0_9] : memref<1x36x64xbf16, #tpu.memory_space<vmem>>, vector<1x4x64xbf16>
    %11 = vector.shape_cast %10 : vector<1x4x64xbf16> to vector<4x64xbf16>
    %12 = arith.extf %11 : vector<4x64xbf16> to vector<4x64xf32>
    %13 = arith.maximumf %9, %12 : vector<4x64xf32>
    %c0_10 = arith.constant 0 : index
    %c28 = arith.constant 28 : index
    %c0_11 = arith.constant 0 : index
    %14 = vector.load %arg2[%c0_10, %c28, %c0_11] : memref<1x36x64xbf16, #tpu.memory_space<vmem>>, vector<1x4x64xbf16>
    %15 = vector.shape_cast %14 : vector<1x4x64xbf16> to vector<4x64xbf16>
    %16 = arith.extf %15 : vector<4x64xbf16> to vector<4x64xf32>
    %c0_12 = arith.constant 0 : index
    %c32 = arith.constant 32 : index
    %c0_13 = arith.constant 0 : index
    %17 = vector.load %arg2[%c0_12, %c32, %c0_13] : memref<1x36x64xbf16, #tpu.memory_space<vmem>>, vector<1x4x64xbf16>
    %18 = vector.shape_cast %17 : vector<1x4x64xbf16> to vector<4x64xbf16>
    %19 = arith.extf %18 : vector<4x64xbf16> to vector<4x64xf32>
    %20 = arith.maximumf %16, %19 : vector<4x64xf32>
    %21 = arith.maximumf %13, %20 : vector<4x64xf32>
    %c0_14 = arith.constant 0 : index
    %c0_15 = arith.constant 0 : index
    %22 = vector.load %arg5[%c0_14, %c0_15] : memref<4x1xf32, #tpu.memory_space<vmem>>, vector<4x1xf32>
    %23 = vector.broadcast %22 : vector<4x1xf32> to vector<4x64xf32>
    %24 = arith.mulf %21, %23 : vector<4x64xf32>
    %c0_16 = arith.constant 0 : index
    %c0_17 = arith.constant 0 : index
    %25 = vector.load %arg6[%c0_16, %c0_17] : memref<4x1xf32, #tpu.memory_space<vmem>>, vector<4x1xf32>
    %26 = vector.broadcast %25 : vector<4x1xf32> to vector<4x64xf32>
    %27 = arith.addf %24, %26 : vector<4x64xf32>
    %cst_18 = arith.constant 0.000000e+00 : f32
    %28 = vector.broadcast %cst_18 : f32 to vector<12x64xf32>
    %29 = arith.maximumf %6, %28 : vector<12x64xf32>
    %c0_19 = arith.constant 0 : index
    %c0_20 = arith.constant 0 : index
    %c0_21 = arith.constant 0 : index
    %30 = vector.load %arg7[%c0_19, %c0_20, %c0_21] : memref<1x16x64xf32, #tpu.memory_space<vmem>>, vector<1x12x64xf32>
    %31 = vector.shape_cast %30 : vector<1x12x64xf32> to vector<12x64xf32>
    %32 = vector.shape_cast %29 : vector<12x64xf32> to vector<1x12x64xf32>
    tpu.vector_store %arg7[%c0_19, %c0_20, %c0_21], %32 {strides = array<i32>} : memref<1x16x64xf32, #tpu.memory_space<vmem>>, vector<1x12x64xf32>,
    %cst_22 = arith.constant 0.000000e+00 : f32
    %33 = vector.broadcast %cst_22 : f32 to vector<4x64xf32>
    %34 = arith.maximumf %27, %33 : vector<4x64xf32>
    %c0_23 = arith.constant 0 : index
    %c12 = arith.constant 12 : index
    %c0_24 = arith.constant 0 : index
    %35 = vector.load %arg7[%c0_23, %c12, %c0_24] : memref<1x16x64xf32, #tpu.memory_space<vmem>>, vector<1x4x64xf32>
    %36 = vector.shape_cast %35 : vector<1x4x64xf32> to vector<4x64xf32>
    %37 = vector.shape_cast %34 : vector<4x64xf32> to vector<1x4x64xf32>
    tpu.vector_store %arg7[%c0_23, %c12, %c0_24], %37 {strides = array<i32>} : memref<1x16x64xf32, #tpu.memory_space<vmem>>, vector<1x4x64xf32>,
    return
  }
  func.func @transform_0(%arg0: i32, %arg1: i32) -> (i32, i32, i32) {
    %c0_i32 = arith.constant 0 : i32
    %c0_i32_0 = arith.constant 0 : i32
    return %arg0, %c0_i32, %arg1 : i32, i32, i32
  }
  func.func @transform_1(%arg0: i32, %arg1: i32) -> (i32, i32) {
    %c0_i32 = arith.constant 0 : i32
    %c0_i32_0 = arith.constant 0 : i32
    %c0_i32_1 = arith.constant 0 : i32
    return %c0_i32, %c0_i32_0 : i32, i32
  }
  func.func @transform_2(%arg0: i32, %arg1: i32) -> (i32, i32) {
    %c0_i32 = arith.constant 0 : i32
    %c0_i32_0 = arith.constant 0 : i32
    %c0_i32_1 = arith.constant 0 : i32
    return %c0_i32, %c0_i32_0 : i32, i32
  }
  func.func @transform_3(%arg0: i32, %arg1: i32) -> (i32, i32) {
    %c0_i32 = arith.constant 0 : i32
    %c0_i32_0 = arith.constant 0 : i32
    %c0_i32_1 = arith.constant 0 : i32
    return %c0_i32, %c0_i32_0 : i32, i32
  }
  func.func @transform_4(%arg0: i32, %arg1: i32) -> (i32, i32) {
    %c0_i32 = arith.constant 0 : i32
    %c0_i32_0 = arith.constant 0 : i32
    %c0_i32_1 = arith.constant 0 : i32
    return %c0_i32, %c0_i32_0 : i32, i32
  }
  func.func @transform_5(%arg0: i32, %arg1: i32) -> (i32, i32, i32) {
    %c0_i32 = arith.constant 0 : i32
    %c0_i32_0 = arith.constant 0 : i32
    return %arg0, %c0_i32, %arg1 : i32, i32, i32
  }
}

</mosaic_0001>

<bundles_post_ra>
// kernel: downsampler_forward.1
= control target key start
LH: loop header
LB: loop body
LE: loop exit
PB: predicated region body
PF: predicated region fallthrough
CT: control target
= control target key end

     0   :  { %s590_s18 = smov 0   ;;  %s592_s19 = smov 0   ;;  %s642_s0 = inlined_call_operand.vmem [shape: bf16[2,36,64], index: 0, kind: input, shape index: {}]   ;;  %s643_s1 = inlined_call_operand.vmem [shape: bf16[12,36], index: 1, kind: input, shape index: {}]   ;;  %s644_s2 = inlined_call_operand.vmem [shape: f32[12,1], index: 2, kind: input, shape index: {}]   ;;  %s645_s3 = inlined_call_operand.vmem [shape: f32[4,1], index: 3, kind: input, shape index: {}]   ;;  %s646_s4 = inlined_call_operand.vmem [shape: f32[4,1], index: 4, kind: input, shape index: {}]   ;;  %s647_s5 = inlined_call_operand.vmem [shape: f32[2,16,64], index: 5, kind: output, shape index: {}]  }
   0x1   :  { %s594_s20 = smov 0  }
   0x2 LB: > { %s27_s21 = sadd.s32 1, %s551_s19  ;;  %p473_p0 = scmp.ge.s32.totalorder %s555_s20, 1  ;;  %s555_s20 = sphi %s594_s20, %s15_s20   ;;  %s551_s19 = sphi %s592_s19, %s649_s19   ;;  %s547_s18 = sphi %s590_s18, %s648_s18  }
   0x3   : > { %p29_p1 = scmp.ge.s32.totalorder %s27_s21, 2  ;;  %p206_p2 = scmp.lt.s32.totalorder %s555_s20, 3 }
   0x5   : > { %s651_s21 = smov (%p29_p1, %s27_s21), 0  ;;  %p207_p3 = pnand %p473_p0, %p206_p2 }
   0x6   : > { %p240_p4 = scmp.lt.s32.totalorder (!%p207_p3), %s547_s18, 1  ;;  %v557_v0 = vmov (!%p207_p3), 0.0   ;;  %vm558_vm0 = vmmov (!%p207_p3), 0   ;;  %v559_v1 = vmov (!%p207_p3), 0   ;;  %v364_v2 = vld [vmem:[%s645_s3] sm:$0xf] (!%p207_p3) }
   0x7   : > { %210 = sbr.rel (%p207_p3) target bundleno = 249 (0xf9), region = 40  ;;  %489 = vmatprep.subr.bf16.mxu0 (!%p207_p3), %v557_v0  ;;  %495 = vmatprep.mubr.msk.bf16.mxu0 (!%p207_p3), %vm558_vm0, %v557_v0  ;;  %v265_v3 = vld [vmem:[%s644_s2 + $0x8] sm:$0xf] (!%p207_p3)  ;;  %v371_v4 = vld [vmem:[%s646_s4] sm:$0xf] (!%p207_p3)  ;;  %vm300_vm1 = vcmask (!%p207_p3), 1041408  }
   0x8   : > { %528 = vset.pattern.permute.xlu1 (!%p207_p3), %v559_v1  ;;  %527 = vset.pattern.permute.xlu0 (!%p207_p3), %v559_v1  ;;  %v264_v5 = vld [vmem:[%s644_s2] sm:$0xff] (!%p207_p3)  ;;  %vm296_vm2 = vcmask (!%p207_p3), 293888   ;;  %vm382_vm3 = vcmask (!%p207_p3), 519168   ;;  %vm380_vm4 = vcmask (!%p207_p3), 523264  }
   0x9   : > { %367 = vperm.xlu0 (!%p207_p3), %527, %v364_v2   ;;  %273 = vperm.xlu1 (!%p207_p3), %528, %v265_v3   ;;  %v532_v22 = vld [vmem:[%s643_s1] sm:$0x3f] (!%p207_p3)  }
   0xd   : > { %374 = vperm.xlu1 (!%p207_p3), %528, %v371_v4   ;;  %268 = vperm.xlu0 (!%p207_p3), %527, %v264_v5  }
   0xe   : > { %s653_s18 = smov (!%p240_p4, %s547_s18), 1 }
   0xf   : > { %s499_s26 = smul.u32 20, %s653_s18  ;;  %s484_s11 = sshll.u32 %s653_s18, 4 }
  0x10   : > { %s255_s14 = scalar_lea.vmem %s647_s5, %s484_s11 }
  0x11   : > { %s247_s8 = scalar_lea.vmem %s642_s0, %s499_s26 }
  0x12   : > { %v529_v6 = vld [vmem:[%s247_s8] sm:$0xff]   ;;  %v530_v7 = vld [vmem:[%s247_s8 + $0x8] sm:$0xff]   ;;  %v263_v8 = vld [vmem:[%s247_s8 + $0x10] sm:$0x3] }
  0x13   : > { %490 = vmatpush3.bf16.msra.mxu0 %v529_v6  ;;  %v345_v9 = vld [vmem:[%s247_s8 + $0x8] sm:$0x3]  ;;  %v347_v10 = vld [vmem:[%s247_s8 + $0x8] sm:$0xc]  ;;  %v480_v11 = vcombine.low %v263_v8, %v263_v8  ;;  %v355_v12 = vunpack.c.l.bf16 %v263_v8  ;;  %v353_v15 = vld [vmem:[%s247_s8 + $0xc] sm:$0xc] }
  0x14   : > { %491 = vmatprep.subr.bf16.mxu0 %v557_v0  ;;  %v346_v13 = vunpack.c.l.bf16 %v345_v9  ;;  %v348_v14 = vunpack.c.l.bf16 %v347_v10  ;;  %v354_v16 = vunpack.c.l.bf16 %v353_v15 }
  0x15   : > { %v357_v17 = vrot.slane %v355_v12, 4  ;;  %v302_v19 = vsel %vm300_vm1, %v480_v11, 0 }
  0x16   : > { %v350_v18 = vrot.slane %v348_v14, 4 }
  0x17   : > { %492 = vmatpush3.bf16.msra.mxu0 %v530_v7  ;;  %v359_v21 = vmax.f32 %v354_v16, %v357_v17 }
  0x18   : > { %493 = vmatprep.subr.bf16.mxu0 %v557_v0  ;;  %v352_v20 = vmax.f32 %v346_v13, %v350_v18 }
  0x19   : > { %v361_v23 = vrot.slane %v359_v21, 4 }
  0x1b   : > { %494 = vmatpush3.bf16.msra.mxu0 %v302_v19  ;;  %v363_v24 = vmax.f32 %v352_v20, %v361_v23 }
  0x1e   : > { %496 = vmatmul.mubr.msk.bf16.vlgmr.msra.gmra.mrb[0].mxu0 %vm296_vm2, %v532_v22 }
  0x88   : > { %v368_v25 = vpop.permute.xlu0 %367  ;;  %v274_v26 = vpop.permute.xlu1 %273 }
  0x89   : > { %v370_v27 = vmul.f32 %v368_v25, %v363_v24 }
  0x8c   : > { %v375_v28 = vpop.permute.xlu1 %374  ;;  %v269_v31 = vpop.permute.xlu0 %268 }
  0x8d   : > { %v377_v29 = vadd.f32 %v375_v28, %v370_v27 }
  0x8f   : > { %v384_v30 = vmax.f32 %v377_v29, 0.0 }
  0x91   : > { %385 = vst.msk [vmem:[%s255_s14 + $0xc] sm:$0xf] %vm382_vm3, %v384_v30 }
  0xf1   : > { %v338_v32 = vpop.f32.mrb[0].mxu0 }
  0xf2   : > { %v339_v33 = vadd.f32 %v338_v32, %v269_v31  ;;  %v497_v34 = vpop.f32.mrb[1].mxu0 }
  0xf3   : > { %v341_v35 = vpop.f32.mrb[2].mxu0 }
  0xf4   : > { %v378_v36 = vmax.f32 %v339_v33, 0.0  ;;  %v342_v37 = vadd.f32 %v341_v35, %v274_v26  ;;  %v498_v38 = vpop.f32.mrb[3].mxu0 }
  0xf6   : > { %381 = vst.msk [vmem:[%s255_s14] sm:$0xff] %vm380_vm4, %v378_v36  ;;  %v379_v39 = vmax.f32 %v342_v37, 0.0 }
  0xf8   : > { %383 = vst.msk [vmem:[%s255_s14 + $0x8] sm:$0xf] %vm382_vm3, %v379_v39 }
  0xf9 PF: > { %s15_s20 = sadd.s32 1, %s555_s20   ;;  %s648_s18 = smov %s551_s19 }
  0xfa   : > { %p12_p5 = scmp.ge.s32.totalorder %s15_s20, 4   ;;  %s649_s19 = smov %s651_s21 }
  0xfc   :  { %14 = sbr.rel (!%p12_p5) target bundleno = 2 (0x2), region = 70 }

</bundles_post_ra>
